<compile_context>
chip_gen: v7x
topology: tpu7x:2x2x1
jax: 0.10.0
libtpu: 0.0.40
codegen_flags: <defaults>
</compile_context>

<pallas_src>
import math

import jax
import jax.numpy as jnp
from jax.experimental import pallas as pl
from jax.experimental.pallas import tpu as pltpu


# ---------------------------------------------------------------------------
# Kernel
# ---------------------------------------------------------------------------
def _simple_rnn_kernel(xin_ref, w_ref, bh_ref, wout_ref, bout_ref,
                       h_ref, y_ref, acc_ref, yacc_ref):
    """Grid = (num_n, num_k): n tiles n_hidden, k tiles the fused input dim.

    acc_ref  (B, tn)        f32  accumulates xin @ W over k for the current n tile.
    yacc_ref (B, n_out_pad) f32  accumulates the output head over all n tiles.
    At the last k step of each n tile: bias + tanh, store h tile, add this
    tile's head contribution.  At the last (n, k) step: add b_out, write y.
    """
    n = pl.program_id(0)
    k = pl.program_id(1)
    last_n = pl.num_programs(0) - 1
    last_k = pl.num_programs(1) - 1

    @pl.when(k == 0)
    def _init_acc():
        acc_ref[...] = jnp.zeros_like(acc_ref)

    @pl.when(jnp.logical_and(n == 0, k == 0))
    def _init_head():
        yacc_ref[...] = jnp.zeros_like(yacc_ref)

    acc_ref[...] += jnp.dot(
        xin_ref[...].astype(w_ref.dtype), w_ref[...],
        preferred_element_type=jnp.float32)

    @pl.when(k == last_k)
    def _finalize_tile():
        h = jnp.tanh(acc_ref[...] + bh_ref[...])          # f32, (B, tn)
        h_ref[...] = h.astype(h_ref.dtype)
        yacc_ref[...] += jnp.dot(h.astype(wout_ref.dtype), wout_ref[...],
                                 preferred_element_type=jnp.float32)

    @pl.when(jnp.logical_and(n == last_n, k == last_k))
    def _finalize_head():
        y_ref[...] = (yacc_ref[...] + bout_ref[...]).astype(y_ref.dtype)


# ---------------------------------------------------------------------------
# Parameter packing / init
# ---------------------------------------------------------------------------
def pack_params(wih_t, whh_t, bih, bhh, wout_t, bout, weight_dtype=jnp.float32):
    """Pack PyTorch-layout (already transposed) weights into the kernel layout."""
    n_input, n_hidden = wih_t.shape
    n_output = wout_t.shape[1]
    n_out_pad = ((n_output + 127) // 128) * 128           # lane-dense head

    w_cat_t = jnp.concatenate([wih_t, whh_t], axis=0).astype(weight_dtype)
    w_ih_t = w_cat_t[:n_input, :]                         # pre-sliced (materialized once)
    b_h = (bih + bhh).reshape(1, n_hidden).astype(jnp.float32)
    wout_pad = jnp.zeros((n_hidden, n_out_pad), weight_dtype)
    wout_pad = wout_pad.at[:, :n_output].set(wout_t.astype(weight_dtype))
    bout_pad = jnp.zeros((1, n_out_pad), jnp.float32)
    bout_pad = bout_pad.at[:, :n_output].set(bout.astype(jnp.float32))

    return {
        "w_cat_t": w_cat_t,      # (n_input + n_hidden, n_hidden)
        "w_ih_t": w_ih_t,        # (n_input, n_hidden)  -- cold-start weight
        "b_h": b_h,              # (1, n_hidden)   = b_ih + b_hh
        "wout_t": wout_pad,      # (n_hidden, n_out_pad)
        "bout": bout_pad,        # (1, n_out_pad)
        "n_input": n_input,
        "n_hidden": n_hidden,
        "n_output": n_output,
    }


def init_params(key, n_input, n_hidden, n_output, weight_dtype=jnp.float32):
    """PyTorch-style init: U(-1/sqrt(n_hidden), 1/sqrt(n_hidden))."""
    ks = jax.random.split(key, 6)
    s = 1.0 / math.sqrt(n_hidden)
    u = lambda kk, shape: jax.random.uniform(kk, shape, jnp.float32, -s, s)
    wih_t = u(ks[0], (n_input, n_hidden))
    whh_t = u(ks[1], (n_hidden, n_hidden))
    bih = u(ks[2], (n_hidden,))
    bhh = u(ks[3], (n_hidden,))
    wout_t = u(ks[4], (n_hidden, n_output))
    bout = u(ks[5], (n_output,))
    return pack_params(wih_t, whh_t, bih, bhh, wout_t, bout, weight_dtype)


# ---------------------------------------------------------------------------
# Wrapper
# ---------------------------------------------------------------------------
def _pick_tile(dim, max_tile):
    """Largest 128-multiple divisor of dim that is <= max_tile, else full dim."""
    if dim <= max_tile:
        return dim
    if dim % 128 != 0:
        return dim
    t = (max_tile // 128) * 128
    while t >= 128:
        if dim % t == 0:
            return t
        t -= 128
    return dim


def simple_rnn_forward(x, params, h=None):
    """x: (B, n_input).  Returns (y (B, n_output), hp (1, B, n_hidden))."""
    B = x.shape[0]
    n_hidden = params["n_hidden"]
    n_output = params["n_output"]
    b_h = params["b_h"]
    wout_t = params["wout_t"]
    bout = params["bout"]
    n_out_pad = wout_t.shape[1]

    if h is None:
        # Cold-start path: skip W_hh entirely (no zero h0, no second matmul,
        # no W_hh HBM traffic).  Weight was pre-sliced at pack time.
        xin = x
        w = params["w_ih_t"]
    else:
        # Fused path: one MXU pass over [x, h0] @ [W_ih^T ; W_hh^T].
        h0 = h.reshape(B, n_hidden).astype(x.dtype)
        xin = jnp.concatenate([x, h0], axis=1)
        w = params["w_cat_t"]

    K_in = xin.shape[1]
    wbytes = jnp.dtype(w.dtype).itemsize
    max_tile = 1024 if wbytes >= 4 else 2048   # dtype-aware; fits v7x 64 MiB VMEM
    tn = _pick_tile(n_hidden, max_tile)
    tk = _pick_tile(K_in, max_tile)
    num_n = n_hidden // tn
    num_k = K_in // tk

    def _nbytes(a):
        return int(a.size) * a.dtype.itemsize

    cost = pl.CostEstimate(
        flops=2 * B * K_in * n_hidden + 2 * B * n_hidden * n_out_pad,
        transcendentals=B * n_hidden,
        bytes_accessed=(_nbytes(xin) + _nbytes(w) + _nbytes(b_h)
                        + _nbytes(wout_t) + _nbytes(bout)
                        + B * n_hidden * 4 + B * n_out_pad * 4),
    )

    h1, y_pad = pl.pallas_call(
        _simple_rnn_kernel,
        grid_spec=pltpu.PrefetchScalarGridSpec(
            num_scalar_prefetch=0,
            grid=(num_n, num_k),
            in_specs=[
                pl.BlockSpec((B, tk), lambda n, k: (0, k)),          # [x, h0]
                pl.BlockSpec((tk, tn), lambda n, k: (k, n)),         # packed W
                pl.BlockSpec((1, tn), lambda n, k: (0, n)),          # b_ih+b_hh
                pl.BlockSpec((tn, n_out_pad), lambda n, k: (n, 0)),  # W_out^T
                pl.BlockSpec((1, n_out_pad), lambda n, k: (0, 0)),   # b_out
            ],
            out_specs=[
                pl.BlockSpec((B, tn), lambda n, k: (0, n)),          # h1
                pl.BlockSpec((B, n_out_pad), lambda n, k: (0, 0)),   # y (resident)
            ],
            scratch_shapes=[
                pltpu.VMEM((B, tn), jnp.float32),         # pre-activation acc (per n)
                pltpu.VMEM((B, n_out_pad), jnp.float32),  # head acc (across n)
            ],
        ),
        out_shape=[
            jax.ShapeDtypeStruct((B, n_hidden), x.dtype),
            jax.ShapeDtypeStruct((B, n_out_pad), x.dtype),
        ],
        compiler_params=pltpu.CompilerParams(
            # Head is accumulated across the n axis in scratch, so both axes
            # are serial; "parallel" vs "arbitrary" is a wash on 1-TC chips.
            dimension_semantics=("arbitrary", "arbitrary"),
            vmem_limit_bytes=48 * 1024 * 1024,
        ),
        cost_estimate=cost,
    )(xin, w, b_h, wout_t, bout)

    y = y_pad[:, :n_output]                 # drop lane padding
    hp = h1.reshape(1, B, n_hidden)         # torch's (num_layers, B, n_hidden)
    return y, hp


# ---------------------------------------------------------------------------
# Pure-JAX reference (mirrors the kernel's weight-dtype rounding)
# ---------------------------------------------------------------------------
def _reference(x, params, h=None):
    wd = params["w_cat_t"].dtype
    n_in, n_h, n_out = params["n_input"], params["n_hidden"], params["n_output"]
    w_cat = params["w_cat_t"].astype(jnp.float32)
    wih_t, whh_t = w_cat[:n_in], w_cat[n_in:]
    wout = params["wout_t"].astype(jnp.float32)[:, :n_out]
    b_h = params["b_h"]
    bout = params["bout"][:, :n_out]
    B = x.shape[0]

    xq = x.astype(wd).astype(jnp.float32)
    if h is None:
        pre = xq @ wih_t + b_h
    else:
        h0 = h.reshape(B, n_h).astype(wd).astype(jnp.float32)
        pre = xq @ wih_t + h0 @ whh_t + b_h
    h1 = jnp.tanh(pre)
    y = h1.astype(wd).astype(jnp.float32) @ wout + bout
    return y, h1.reshape(1, B, n_h)


# ---------------------------------------------------------------------------
if __name__ == "__main__":
    n_input, n_hidden, n_output = 16, 32, 8
    B = 2

    key = jax.random.PRNGKey(0)
    k_x, k_h, k_p = jax.random.split(key, 3)
    x = jax.random.normal(k_x, (B, n_input), dtype=jnp.float32)
    h_in = jax.random.normal(k_h, (1, B, n_hidden), dtype=jnp.float32)

    # --- f32 weights (matches PyTorch default semantics) --------------------
    params = init_params(k_p, n_input, n_hidden, n_output, weight_dtype=jnp.float32)

    # h=None path (cold start: no W_hh load, no zero-h0 matmul)
    y, hp = jax.block_until_ready(simple_rnn_forward(x, params))
    y_ref, hp_ref = _reference(x, params)
    assert y.shape == (B, n_output)
    assert hp.shape == (1, B, n_hidden)
    assert jnp.allclose(y, y_ref, atol=1e-5, rtol=1e-5)
    assert jnp.allclose(hp, hp_ref, atol=1e-5, rtol=1e-5)

    # h provided path (single fused [x, h0] matmul)
    y2, hp2 = jax.block_until_ready(simple_rnn_forward(x, params, h_in))
    y2_ref, hp2_ref = _reference(x, params, h_in)
    assert jnp.allclose(y2, y2_ref, atol=1e-5, rtol=1e-5)
    assert jnp.allclose(hp2, hp2_ref, atol=1e-5, rtol=1e-5)

    # --- bf16 weights (f32 accumulation), halves HBM weight traffic ---------
    params_bf16 = init_params(k_p, n_input, n_hidden, n_output,
                              weight_dtype=jnp.bfloat16)
    y3, hp3 = jax.block_until_ready(simple_rnn_forward(x, params_bf16, h_in))
    y3_ref, hp3_ref = _reference(x, params_bf16, h_in)
    assert jnp.allclose(y3, y3_ref, atol=2e-2, rtol=2e-2)
    assert jnp.allclose(hp3, hp3_ref, atol=2e-2, rtol=2e-2)

    print("KERNEL_OK")
</pallas_src>

<mosaic_0001>
module attributes {stable_mosaic.version = 11 : i64} {
  func.func @_simple_rnn_kernel(%arg0: i32, %arg1: i32, %arg2: memref<2x16xf32, #tpu.memory_space<vmem>>, %arg3: memref<16x32xf32, #tpu.memory_space<vmem>>, %arg4: memref<1x32xf32, #tpu.memory_space<vmem>>, %arg5: memref<32x128xf32, #tpu.memory_space<vmem>>, %arg6: memref<1x128xf32, #tpu.memory_space<vmem>>, %arg7: memref<2x32xf32, #tpu.memory_space<vmem>>, %arg8: memref<2x128xf32, #tpu.memory_space<vmem>>, %arg9: memref<2x32xf32, #tpu.memory_space<vmem>>, %arg10: memref<2x128xf32, #tpu.memory_space<vmem>>) attributes {dimension_semantics = [#tpu.dimension_semantics<arbitrary>, #tpu.dimension_semantics<arbitrary>], iteration_bounds = array<i64: 1, 1>, scalar_prefetch = 0 : i64, scratch_operands = 2 : i64, tpu.core_type = #tpu.core_type<tc>, window_params = [{transform_indices = @transform_0, window_bounds = array<i64: 2, 16>}, {transform_indices = @transform_1, window_bounds = array<i64: 16, 32>}, {transform_indices = @transform_2, window_bounds = array<i64: 1, 32>}, {transform_indices = @transform_3, window_bounds = array<i64: 32, 128>}, {pipeline_mode = #tpu.pipeline_mode<synchronous>, transform_indices = @transform_4, window_bounds = array<i64: 1, 128>}, {transform_indices = @transform_5, window_bounds = array<i64: 2, 32>}, {pipeline_mode = #tpu.pipeline_mode<synchronous>, transform_indices = @transform_6, window_bounds = array<i64: 2, 128>}]} {
    %c0_i32 = arith.constant 0 : i32
    %0 = arith.cmpi eq, %arg1, %c0_i32 : i32
    %1 = arith.extui %0 : i1 to i32
    %c0_i32_0 = arith.constant 0 : i32
    %2 = arith.cmpi ne, %1, %c0_i32_0 : i32
    scf.if %2 {
      %cst_16 = arith.constant 0.000000e+00 : f32
      %22 = vector.broadcast %cst_16 : f32 to vector<2x32xf32>
      %c0_17 = arith.constant 0 : index
      %c0_18 = arith.constant 0 : index
      %23 = vector.load %arg9[%c0_17, %c0_18] : memref<2x32xf32, #tpu.memory_space<vmem>>, vector<2x32xf32>
      tpu.vector_store %arg9[%c0_17, %c0_18], %22 {strides = array<i32>} : memref<2x32xf32, #tpu.memory_space<vmem>>, vector<2x32xf32>,
    } else {
    }
    %c0_i32_1 = arith.constant 0 : i32
    %3 = arith.cmpi eq, %arg0, %c0_i32_1 : i32
    %c0_i32_2 = arith.constant 0 : i32
    %4 = arith.cmpi eq, %arg1, %c0_i32_2 : i32
    %5 = arith.andi %3, %4 : i1
    %6 = arith.extui %5 : i1 to i32
    %c0_i32_3 = arith.constant 0 : i32
    %7 = arith.cmpi ne, %6, %c0_i32_3 : i32
    scf.if %7 {
      %cst_16 = arith.constant 0.000000e+00 : f32
      %22 = vector.broadcast %cst_16 : f32 to vector<2x128xf32>
      %c0_17 = arith.constant 0 : index
      %c0_18 = arith.constant 0 : index
      %23 = vector.load %arg10[%c0_17, %c0_18] : memref<2x128xf32, #tpu.memory_space<vmem>>, vector<2x128xf32>
      tpu.vector_store %arg10[%c0_17, %c0_18], %22 {strides = array<i32>} : memref<2x128xf32, #tpu.memory_space<vmem>>, vector<2x128xf32>,
    } else {
    }
    %c0 = arith.constant 0 : index
    %c0_4 = arith.constant 0 : index
    %8 = vector.load %arg9[%c0, %c0_4] : memref<2x32xf32, #tpu.memory_space<vmem>>, vector<2x32xf32>
    %c0_5 = arith.constant 0 : index
    %c0_6 = arith.constant 0 : index
    %9 = vector.load %arg2[%c0_5, %c0_6] : memref<2x16xf32, #tpu.memory_space<vmem>>, vector<2x16xf32>
    %c0_7 = arith.constant 0 : index
    %c0_8 = arith.constant 0 : index
    %10 = vector.load %arg3[%c0_7, %c0_8] : memref<16x32xf32, #tpu.memory_space<vmem>>, vector<16x32xf32>
    %cst = arith.constant dense<0.000000e+00> : vector<2x32xf32>
    %11 = tpu.matmul %9, %10, %cst {dimension_numbers = #tpu.dot_dimension_numbers<[1], [0], [0], [1], [0, 0, 1, 1], [], []>} : vector<2x16xf32>, vector<16x32xf32>, vector<2x32xf32> -> vector<2x32xf32>
    %12 = arith.addf %8, %11 : vector<2x32xf32>
    %c0_9 = arith.constant 0 : index
    %c0_10 = arith.constant 0 : index
    %13 = vector.load %arg9[%c0_9, %c0_10] : memref<2x32xf32, #tpu.memory_space<vmem>>, vector<2x32xf32>
    tpu.vector_store %arg9[%c0_9, %c0_10], %12 {strides = array<i32>} : memref<2x32xf32, #tpu.memory_space<vmem>>, vector<2x32xf32>,
    %c0_i32_11 = arith.constant 0 : i32
    %14 = arith.cmpi eq, %arg1, %c0_i32_11 : i32
    %15 = arith.extui %14 : i1 to i32
    %c0_i32_12 = arith.constant 0 : i32
    %16 = arith.cmpi ne, %15, %c0_i32_12 : i32
    scf.if %16 {
      %c0_16 = arith.constant 0 : index
      %c0_17 = arith.constant 0 : index
      %22 = vector.load %arg9[%c0_16, %c0_17] : memref<2x32xf32, #tpu.memory_space<vmem>>, vector<2x32xf32>
      %c0_18 = arith.constant 0 : index
      %c0_19 = arith.constant 0 : index
      %23 = vector.load %arg4[%c0_18, %c0_19] : memref<1x32xf32, #tpu.memory_space<vmem>>, vector<1x32xf32>
      %24 = vector.broadcast %23 : vector<1x32xf32> to vector<2x32xf32>
      %25 = arith.addf %22, %24 : vector<2x32xf32>
      %26 = math.tanh %25 : vector<2x32xf32>
      %c0_20 = arith.constant 0 : index
      %c0_21 = arith.constant 0 : index
      %27 = vector.load %arg7[%c0_20, %c0_21] : memref<2x32xf32, #tpu.memory_space<vmem>>, vector<2x32xf32>
      tpu.vector_store %arg7[%c0_20, %c0_21], %26 {strides = array<i32>} : memref<2x32xf32, #tpu.memory_space<vmem>>, vector<2x32xf32>,
      %c0_22 = arith.constant 0 : index
      %c0_23 = arith.constant 0 : index
      %28 = vector.load %arg10[%c0_22, %c0_23] : memref<2x128xf32, #tpu.memory_space<vmem>>, vector<2x128xf32>
      %c0_24 = arith.constant 0 : index
      %c0_25 = arith.constant 0 : index
      %29 = vector.load %arg5[%c0_24, %c0_25] : memref<32x128xf32, #tpu.memory_space<vmem>>, vector<32x128xf32>
      %cst_26 = arith.constant dense<0.000000e+00> : vector<2x128xf32>
      %30 = tpu.matmul %26, %29, %cst_26 {dimension_numbers = #tpu.dot_dimension_numbers<[1], [0], [0], [1], [0, 0, 1, 1], [], []>} : vector<2x32xf32>, vector<32x128xf32>, vector<2x128xf32> -> vector<2x128xf32>
      %31 = arith.addf %28, %30 : vector<2x128xf32>
      %c0_27 = arith.constant 0 : index
      %c0_28 = arith.constant 0 : index
      %32 = vector.load %arg10[%c0_27, %c0_28] : memref<2x128xf32, #tpu.memory_space<vmem>>, vector<2x128xf32>
      tpu.vector_store %arg10[%c0_27, %c0_28], %31 {strides = array<i32>} : memref<2x128xf32, #tpu.memory_space<vmem>>, vector<2x128xf32>,
    } else {
    }
    %c0_i32_13 = arith.constant 0 : i32
    %17 = arith.cmpi eq, %arg0, %c0_i32_13 : i32
    %c0_i32_14 = arith.constant 0 : i32
    %18 = arith.cmpi eq, %arg1, %c0_i32_14 : i32
    %19 = arith.andi %17, %18 : i1
    %20 = arith.extui %19 : i1 to i32
    %c0_i32_15 = arith.constant 0 : i32
    %21 = arith.cmpi ne, %20, %c0_i32_15 : i32
    scf.if %21 {
      %c0_16 = arith.constant 0 : index
      %c0_17 = arith.constant 0 : index
      %22 = vector.load %arg10[%c0_16, %c0_17] : memref<2x128xf32, #tpu.memory_space<vmem>>, vector<2x128xf32>
      %c0_18 = arith.constant 0 : index
      %c0_19 = arith.constant 0 : index
      %23 = vector.load %arg6[%c0_18, %c0_19] : memref<1x128xf32, #tpu.memory_space<vmem>>, vector<1x128xf32>
      %24 = vector.broadcast %23 : vector<1x128xf32> to vector<2x128xf32>
      %25 = arith.addf %22, %24 : vector<2x128xf32>
      %c0_20 = arith.constant 0 : index
      %c0_21 = arith.constant 0 : index
      %26 = vector.load %arg8[%c0_20, %c0_21] : memref<2x128xf32, #tpu.memory_space<vmem>>, vector<2x128xf32>
      tpu.vector_store %arg8[%c0_20, %c0_21], %25 {strides = array<i32>} : memref<2x128xf32, #tpu.memory_space<vmem>>, vector<2x128xf32>,
    } else {
    }
    return
  }
  func.func @transform_0(%arg0: i32, %arg1: i32) -> (i32, i32) {
    %c0_i32 = arith.constant 0 : i32
    %c0_i32_0 = arith.constant 0 : i32
    return %c0_i32, %arg1 : i32, i32
  }
  func.func @transform_1(%arg0: i32, %arg1: i32) -> (i32, i32) {
    %c0_i32 = arith.constant 0 : i32
    return %arg1, %arg0 : i32, i32
  }
  func.func @transform_2(%arg0: i32, %arg1: i32) -> (i32, i32) {
    %c0_i32 = arith.constant 0 : i32
    %c0_i32_0 = arith.constant 0 : i32
    return %c0_i32, %arg0 : i32, i32
  }
  func.func @transform_3(%arg0: i32, %arg1: i32) -> (i32, i32) {
    %c0_i32 = arith.constant 0 : i32
    %c0_i32_0 = arith.constant 0 : i32
    return %arg0, %c0_i32 : i32, i32
  }
  func.func @transform_4(%arg0: i32, %arg1: i32) -> (i32, i32) {
    %c0_i32 = arith.constant 0 : i32
    %c0_i32_0 = arith.constant 0 : i32
    %c0_i32_1 = arith.constant 0 : i32
    return %c0_i32, %c0_i32_0 : i32, i32
  }
  func.func @transform_5(%arg0: i32, %arg1: i32) -> (i32, i32) {
    %c0_i32 = arith.constant 0 : i32
    %c0_i32_0 = arith.constant 0 : i32
    return %c0_i32, %arg0 : i32, i32
  }
  func.func @transform_6(%arg0: i32, %arg1: i32) -> (i32, i32) {
    %c0_i32 = arith.constant 0 : i32
    %c0_i32_0 = arith.constant 0 : i32
    %c0_i32_1 = arith.constant 0 : i32
    return %c0_i32, %c0_i32_0 : i32, i32
  }
}

</mosaic_0001>

<bundles_post_ra>
// kernel: tpu_custom_call.1
= control target key start
LH: loop header
LB: loop body
LE: loop exit
PB: predicated region body
PF: predicated region fallthrough
CT: control target
= control target key end

     0   :  { %12 = vsyncpa [#allocation5], 0  ;;  %s582_s0 = inlined_call_operand.hbm [shape: f32[2,16], index: 0, kind: input, shape index: {}]   ;;  %s583_s1 = inlined_call_operand.hbm [shape: f32[16,32], index: 1, kind: input, shape index: {}]   ;;  %s584_s2 = inlined_call_operand.vmem [shape: f32[1,32], index: 2, kind: input, shape index: {}]   ;;  %s585_s3 = inlined_call_operand.hbm [shape: f32[32,128], index: 3, kind: input, shape index: {}]   ;;  %s586_s4 = inlined_call_operand.vmem [shape: f32[1,128], index: 4, kind: input, shape index: {}]   ;;  %s587_s5 = inlined_call_operand.hbm [shape: f32[2,32], index: 5, kind: output, shape index: {0}]   ;;  %s588_s6 = inlined_call_operand.hbm [shape: f32[2,128], index: 6, kind: output, shape index: {1}]  }
   0x1   :  { %13 = vsyncpa [#allocation8], 0 }
   0x2   :  { %14 = vsyncpa [#allocation6], 0 }
   0x3   :  { %15 = vsyncpa [#allocation12], 0  ;;  %s462_s21 = smov [#allocation7]   ;;  %s344_s25 = scalar_lea.hbm %s583_s1, 256 }
   0x4   :  { %s31_s22 = sshll.u32 %s462_s21, 4  ;;  %p345_p0 = scmp.ne.s32.totalorder %s583_s1, %s344_s25  ;;  %s32_s22 = int_to_ptr.vmem [resolvable:$true] %s31_s22 }
   0x5   :  { %p348_p1 = scmp.lt.u32.totalorder %s344_s25, %s583_s1 }
   0x7   :  { %p350_p2 = pnand %p348_p1, %p345_p0 }
   0x9   :  { %353 = shalt.err (!%p350_p2)
}
   0xa   :  { %s354_s30 = scalar_lea.vmem %s32_s22, 256  ;;  %p359_p4 = scmp.lt.s32.totalorder %s32_s22, %s32_s22 }
   0xb   :  { %p355_p3 = scmp.ne.s32.totalorder %s32_s22, %s354_s30  ;;  %p360_p5 = scmp.lt.s32.totalorder %s354_s30, %s354_s30 }
   0xd   :  { %p361_p6 = por %p360_p5, %p359_p4 }
   0xf   :  { %p362_p7 = pnand %p361_p6, %p355_p3 }
  0x11   :  { %365 = shalt.err (!%p362_p7)
}
  0x12   :  { %s463_s7 = smov 128   ;;  %s464_s8 = smov 8  }
  0x13   :  { %37 = dma.hbm_to_vmem [thread:$0]  %s583_s1, 256, %s32_s22, [#allocation8], %s463_s7, %s463_s7, %s464_s8  }
  0x14   :  { %s465_s11 = smov [#allocation4]   ;;  %s466_s13 = smov [#allocation9]  }
  0x15   :  { %s22_s12 = sshll.u32 %s465_s11, 4  ;;  %s45_s14 = sshll.u32 %s466_s13, 4  ;;  %s23_s12 = int_to_ptr.vmem [resolvable:$true] %s22_s12  ;;  %s46_s14 = int_to_ptr.vmem [resolvable:$true] %s45_s14 }
  0x16   :  { %s366_s17 = scalar_lea.hbm %s582_s0, 32 }
  0x17   :  { %p367_p8 = scmp.ne.s32.totalorder %s582_s0, %s366_s17  ;;  %p370_p9 = scmp.lt.u32.totalorder %s366_s17, %s582_s0 }
  0x19   :  { %p372_p10 = pnand %p370_p9, %p367_p8 }
  0x1b   :  { %375 = shalt.err (!%p372_p10)
}
  0x1c   :  { %s376_s1 = scalar_lea.vmem %s23_s12, 32  ;;  %p381_p12 = scmp.lt.s32.totalorder %s23_s12, %s23_s12 }
  0x1d   :  { %p377_p11 = scmp.ne.s32.totalorder %s23_s12, %s376_s1  ;;  %p382_p13 = scmp.lt.s32.totalorder %s376_s1, %s376_s1 }
  0x1f   :  { %p383_p0 = por %p382_p13, %p381_p12 }
  0x21   :  { %p384_p1 = pnand %p383_p0, %p377_p11 }
  0x23   :  { %387 = shalt.err (!%p384_p1)
}
  0x24   :  { %25 = dma.hbm_to_vmem [thread:$0]  %s582_s0, 32, %s23_s12, [#allocation5]  }
  0x25   :  { %s388_s26 = scalar_lea.hbm %s585_s3, 512 }
  0x26   :  { %p389_p2 = scmp.ne.s32.totalorder %s585_s3, %s388_s26  ;;  %p392_p3 = scmp.lt.u32.totalorder %s388_s26, %s585_s3 }
  0x28   :  { %p394_p4 = pnand %p392_p3, %p389_p2 }
  0x2a   :  { %397 = shalt.err (!%p394_p4)
}
  0x2b   :  { %s398_s9 = scalar_lea.vmem %s46_s14, 512  ;;  %p403_p6 = scmp.lt.s32.totalorder %s46_s14, %s46_s14 }
  0x2c   :  { %p399_p5 = scmp.ne.s32.totalorder %s46_s14, %s398_s9  ;;  %p404_p7 = scmp.lt.s32.totalorder %s398_s9, %s398_s9 }
  0x2e   :  { %p405_p8 = por %p404_p7, %p403_p6 }
  0x30   :  { %p406_p9 = pnand %p405_p8, %p399_p5 }
  0x32   :  { %409 = shalt.err (!%p406_p9)
}
  0x33   :  { %51 = dma.hbm_to_vmem [thread:$0]  %s585_s3, 512, %s46_s14, [#allocation8], %s463_s7, %s463_s7, %s464_s8  }
  0x34   :  { %454 = dma.done.wait [#allocation5], 32  }
  0x35   :  { %455 = vsyncadd [#allocation5], 4294967264 }
  0x36   :  { %456 = dma.done.wait [#allocation8], 768  }
  0x37   :  { %457 = vsyncadd [#allocation8], 4294966528  ;;  %vm67_vm0 = vcmask 254976   ;;  %v467_v0 = vmov 0.0|0.0   ;;  %v468_v1 = vmov 0.0   ;;  %vm469_vm1 = vmmov 0  }
  0x38   :  { %323 = vmatprep.subr.bf16.mxu0 %v467_v0  ;;  %68 = vst.msk [vmem:[#allocation2] sm:$0x3] %vm67_vm0, %v468_v1  ;;  %74 = vst [vmem:[#allocation3] sm:$0x3] %v468_v1  ;;  %309 = vmatprep.mubr.msk.f32.mxu0 %vm469_vm1, %v468_v1  ;;  %v77_v2 = vld [vmem:[#allocation7] sm:$0xff]  ;;  %v78_v3 = vld [vmem:[#allocation7 + $0x8] sm:$0xff] }
  0x39   :  { %326 = vmatprep.subr.bf16.mxu1 %v467_v0  ;;  %320 = vmatprep.mubr.msk.f32.mxu1 %vm469_vm1, %v468_v1  ;;  %v324_v4 = vpack.c.bf16 %v78_v3, %v77_v2  ;;  %v76_v5 = vld [vmem:[#allocation4] sm:$0x3]  ;;  %vm79_vm2 = vcmask 130048   ;;  %v171_v6 = vld [vmem:[#allocation9] sm:$0xff]  ;;  %v173_v9 = vld [vmem:[#allocation9 + $0x10] sm:$0xff]  ;;  %vm175_vm3 = vcmask 261120  }
  0x3a   :  { %v172_v7 = vld [vmem:[#allocation9 + $0x8] sm:$0xff]  ;;  %v174_v10 = vld [vmem:[#allocation9 + $0x18] sm:$0xff]  ;;  %s470_s8 = smov [#allocation10]  }
  0x3b   :  { %325 = vmatpush3.bf16.msra.mxu0 %v324_v4  ;;  %v327_v8 = vpack.c.bf16 %v172_v7, %v171_v6  ;;  %v330_v11 = vpack.c.bf16 %v174_v10, %v173_v9  ;;  %v294_v16 = vld [vmem:[%s584_s2] ss:$0 sm:$0xff]  ;;  %s269_s11 = sshll.u32 %s470_s8, 4  ;;  %s270_s11 = int_to_ptr.vmem [resolvable:$true] %s269_s11 }
  0x3c   :  { %s410_s12 = scalar_lea.vmem %s270_s11, 32  ;;  %p415_p11 = scmp.lt.s32.totalorder %s270_s11, %s270_s11 }
  0x3d   :  { %328 = vmatpush3.bf16.msra.mxu1 %v327_v8  ;;  %p411_p10 = scmp.ne.s32.totalorder %s270_s11, %s410_s12  ;;  %p416_p12 = scmp.lt.s32.totalorder %s410_s12, %s410_s12 }
  0x3e   :  { %310 = vmatmul.mubr.msk.f32.vlgmr.msra.gmra.mrb[0].mxu0 %vm79_vm2, %v76_v5  ;;  %329 = vmatprep.subr.bf16.mxu1 %v467_v0 }
  0x3f   :  { %v75_v12 = vld [vmem:[#allocation2] sm:$0x3]  ;;  %p417_p13 = por %p416_p12, %p415_p11 }
  0x41   :  { %331 = vmatpush3.bf16.msra.mxu1 %v330_v11  ;;  %p418_p0 = pnand %p417_p13, %p411_p10 }
 0x111   :  { %v149_v13 = vpop.f32.mrb[0].mxu0 }
 0x112   :  { %v153_v14 = vadd.f32 %v149_v13, %v75_v12  ;;  %v311_v15 = vpop.f32.mrb[1].mxu0 }
 0x114   :  { %155 = vst.msk [vmem:[#allocation2] sm:$0x3] %vm67_vm0, %v153_v14 }
 0x11b   :  { %v159_v17 = vld [vmem:[#allocation2] sm:$0x3] }
 0x11c   :  { %v167_v18 = vadd.f32 %v294_v16, %v159_v17 }
 0x11e   :  { %342 = vtanh.f32 %v167_v18 }
 0x128   :  { %v343_v19 = vpop.eup %342 }
 0x129   :  { %169 = vst.msk [vmem:[#allocation10] sm:$0x3] %vm67_vm0, %v343_v19  ;;  %321 = vmatmul.mubr.msk.f32.vlgmr.msra.gmra.mrb[0].mxu1 %vm175_vm3, %v343_v19 }
 0x12a   :  { %421 = shalt.err (!%p418_p0)
}
 0x12b   :  { %s422_s14 = scalar_lea.hbm %s587_s5, 32 }
 0x12c   :  { %p423_p1 = scmp.ne.s32.totalorder %s587_s5, %s422_s14  ;;  %p426_p2 = scmp.lt.u32.totalorder %s422_s14, %s587_s5 }
 0x12e   :  { %p428_p3 = pnand %p426_p2, %p423_p1 }
 0x130   :  { %431 = shalt.err (!%p428_p3)
}
 0x131   :  { %272 = dma.vmem_to_hbm [thread:$0]  %s270_s11, 32, %s587_s5, [#allocation6]   ;;  %v170_v20 = vld [vmem:[#allocation3] sm:$0x3]  ;;  %v296_v24 = vld [vmem:[%s586_s4] ss:$0 sm:$0xff] }
 0x132   :  { %s471_s22 = smov [#allocation11]  }
 0x133   :  { %s279_s23 = sshll.u32 %s471_s22, 4  ;;  %s280_s23 = int_to_ptr.vmem [resolvable:$true] %s279_s23 }
 0x134   :  { %s432_s24 = scalar_lea.vmem %s280_s23, 32  ;;  %p437_p5 = scmp.lt.s32.totalorder %s280_s23, %s280_s23 }
 0x135   :  { %p433_p4 = scmp.ne.s32.totalorder %s280_s23, %s432_s24  ;;  %p438_p6 = scmp.lt.s32.totalorder %s432_s24, %s432_s24 }
 0x137   :  { %p439_p7 = por %p438_p6, %p437_p5 }
 0x139   :  { %p440_p8 = pnand %p439_p7, %p433_p4 }
 0x1fc   :  { %v245_v21 = vpop.f32.mrb[0].mxu1 }
 0x1fd   :  { %v249_v22 = vadd.f32 %v245_v21, %v170_v20  ;;  %v322_v23 = vpop.f32.mrb[1].mxu1 }
 0x1ff   :  { %250 = vst [vmem:[#allocation3] sm:$0x3] %v249_v22 }
 0x206   :  { %v253_v25 = vld [vmem:[#allocation3] sm:$0x3] }
 0x207   :  { %v261_v26 = vadd.f32 %v296_v24, %v253_v25 }
 0x209   :  { %262 = vst [vmem:[#allocation11] sm:$0x3] %v261_v26 }
 0x20a   :  { %443 = shalt.err (!%p440_p8)
}
 0x20b   :  { %s444_s26 = scalar_lea.hbm %s588_s6, 32 }
 0x20c   :  { %p445_p9 = scmp.ne.s32.totalorder %s588_s6, %s444_s26  ;;  %p448_p10 = scmp.lt.u32.totalorder %s444_s26, %s588_s6 }
 0x20e   :  { %p450_p11 = pnand %p448_p10, %p445_p9 }
 0x210   :  { %453 = shalt.err (!%p450_p11)
}
 0x211   :  { %282 = dma.vmem_to_hbm [thread:$0]  %s280_s23, 32, %s588_s6, [#allocation12]  }
 0x212   :  { %458 = dma.done.wait [#allocation6], 32  }
 0x213   :  { %459 = vsyncadd [#allocation6], 4294967264 }
 0x214   :  { %460 = dma.done.wait [#allocation12], 32  }
 0x215   :  { %461 = vsyncadd [#allocation12], 4294967264 }
 0x216   :  { %289 = vsyncpa [#allocation5], 1 }
 0x217   :  { %290 = vsyncpa [#allocation8], 1 }
 0x218   :  { %291 = vsyncpa [#allocation6], 1 }
 0x219   :  { %292 = vsyncpa [#allocation12], 1 }

</bundles_post_ra>
